<compile_context>
chip_gen: v7x
topology: tpu7x:2x2x1
jax: 0.10.0
libtpu: 0.0.40
codegen_flags: <defaults>
</compile_context>

<pallas_src>
import functools

import jax
import jax.numpy as jnp
from jax.experimental import pallas as pl
from jax.experimental.pallas import tpu as pltpu


def mcp_kernel(x_ref, w_ref, xn_ref, wn_ref, label_ref, o_ref, *,
               s_times_m, eps_over_s, tn):
    # x_ref:     (tm, K)  bf16 block of input rows       (resident across j)
    # w_ref:     (tn, K)  bf16 block of class weights
    # xn_ref:    (tm, 1)  f32  ||x|| / s                 (resident across j)
    # wn_ref:    (1, tn)  f32  ||w||
    # label_ref: (tm, 1)  i32  labels                    (resident across j)
    # o_ref:     (tm, tn) f32  output logits tile

    # Inner products on the MXU: (tm, K) x (K, tn), bf16 in, f32 accumulate.
    ip = jax.lax.dot_general(
        x_ref[...], w_ref[...], (((1,), (1,)), ((), ())),
        preferred_element_type=jnp.float32)                      # (tm, tn)

    # s * cosine = ip * [ s / max(||x||*||w||, eps) ]
    #            = ip * [ 1 / max((||x||/s)*||w||, eps/s) ]   (scale pre-folded)
    inv = pl.reciprocal(
        jnp.maximum(xn_ref[...] * wn_ref[...], eps_over_s),
        approx=True)                                             # (tm, tn), EUP
    scaled = ip * inv                                            # s * cosine

    # One-hot margin without scatter: local column iota vs (label - j*tn).
    local_label = label_ref[...] - pl.program_id(1) * tn         # (tm, 1) i32
    col = jax.lax.broadcasted_iota(jnp.int32, scaled.shape, 1)   # loop-invariant
    o_ref[...] = jnp.where(col == local_label,
                           scaled - s_times_m, scaled).astype(o_ref.dtype)


def _round_up(x, mult):
    return (x + mult - 1) // mult * mult


def _choose_tiles(n_pad, c_pad, k):
    """Pick (tm, tn) under a conservative, v7x-safe VMEM budget."""
    budget = 12 * 1024 * 1024  # double-buffered blocks; well under 32 MiB scoped

    def vmem_bytes(tm, tn):
        # 2x buffering of: x (bf16), w (bf16), out (f32), norms + labels (f32/i32)
        return 2 * (tm * k * 2 + tn * k * 2 + tm * tn * 4 + (2 * tm + tn) * 4)

    # Largest lane-dense class tile first; keep >= 2 steps on the parallel
    # class axis when possible so both TensorCores (v7x) get work.
    tn_cands = [t for t in (512, 256, 128) if c_pad % t == 0]
    multi = [t for t in tn_cands if c_pad // t >= 2]
    if multi:
        tn_cands = multi

    # Keep the whole (padded) batch resident if it is small enough: the weight
    # matrix then streams from HBM exactly once (minimum possible traffic).
    tm_cands = ([n_pad] if n_pad <= 1024 else [])
    tm_cands += [t for t in (512, 256, 128, 64, 32, 16, 8) if n_pad % t == 0]

    for tn in tn_cands:
        for tm in tm_cands:
            if vmem_bytes(tm, tn) <= budget:
                return tm, tn
    return 8, 128  # minimal fallback (only for extremely large K)


def margin_cosine_product(x, weight, label, *, scale=30.0, m=0.4, eps=1e-8):
    """x: (N, K); weight: (C, K); label: (N,) int -> (N, C) f32 logits."""
    N, K = x.shape
    C, K2 = weight.shape
    assert K == K2, "in_features mismatch"

    xf = jnp.asarray(x, jnp.float32)
    wf = jnp.asarray(weight, jnp.float32)

    # Precompute row norms once, in f32 (review item: no per-tile recompute).
    x_norm = jnp.sqrt(jnp.sum(xf * xf, axis=1, keepdims=True))          # (N, 1)
    w_norm = jnp.sqrt(jnp.sum(wf * wf, axis=1, keepdims=True)).T        # (1, C)
    x_norm_over_s = x_norm / scale   # fold `scale` into the reciprocal path

    # Pad to sublane/lane-dense shapes; padded rows/cols are zero and sliced
    # off the output (keeps unmasked vst stores and bounded VMEM blocks).
    n_pad = _round_up(N, 8)
    c_pad = _round_up(C, 128)

    x_bf = jnp.zeros((n_pad, K), jnp.bfloat16).at[:N].set(xf.astype(jnp.bfloat16))
    w_bf = jnp.zeros((c_pad, K), jnp.bfloat16).at[:C].set(wf.astype(jnp.bfloat16))
    xn_p = jnp.zeros((n_pad, 1), jnp.float32).at[:N].set(x_norm_over_s)
    wn_p = jnp.zeros((1, c_pad), jnp.float32).at[:, :C].set(w_norm)
    lbl_p = jnp.full((n_pad, 1), -1, jnp.int32).at[:N, 0].set(
        jnp.asarray(label, jnp.int32))

    tm, tn = _choose_tiles(n_pad, c_pad, K)
    assert n_pad % tm == 0 and c_pad % tn == 0

    kernel = functools.partial(
        mcp_kernel,
        s_times_m=float(scale) * float(m),
        eps_over_s=float(eps) / float(scale),
        tn=tn)

    out = pl.pallas_call(
        kernel,
        out_shape=jax.ShapeDtypeStruct((n_pad, c_pad), jnp.float32),
        grid_spec=pltpu.PrefetchScalarGridSpec(
            num_scalar_prefetch=0,
            grid=(n_pad // tm, c_pad // tn),   # class axis innermost -> x resident
            in_specs=[
                pl.BlockSpec((tm, K), lambda i, j: (i, 0)),   # x rows (resident)
                pl.BlockSpec((tn, K), lambda i, j: (j, 0)),   # class weights
                pl.BlockSpec((tm, 1), lambda i, j: (i, 0)),   # ||x||/s (resident)
                pl.BlockSpec((1, tn), lambda i, j: (0, j)),   # ||w||
                pl.BlockSpec((tm, 1), lambda i, j: (i, 0)),   # labels (resident)
            ],
            out_specs=pl.BlockSpec((tm, tn), lambda i, j: (i, j)),
        ),
        compiler_params=pltpu.CompilerParams(
            dimension_semantics=("parallel", "parallel"),
        ),
        cost_estimate=pl.CostEstimate(
            flops=2 * n_pad * c_pad * K,
            bytes_accessed=(n_pad * K * 2 + c_pad * K * 2
                            + n_pad * c_pad * 4 + (2 * n_pad + c_pad) * 4),
            transcendentals=0),
    )(x_bf, w_bf, xn_p, wn_p, lbl_p)

    return out[:N, :C]


def reference_mcp(x, weight, label, scale=30.0, m=0.4, eps=1e-8):
    """Pure-JAX reference matching PyTorch MarginCosineProduct semantics."""
    ip = jnp.dot(x, weight.T, precision=jax.lax.Precision.HIGHEST)
    xn = jnp.linalg.norm(x, axis=1)
    wn = jnp.linalg.norm(weight, axis=1)
    cosine = ip / jnp.maximum(jnp.outer(xn, wn), eps)
    one_hot = jax.nn.one_hot(label, weight.shape[0], dtype=cosine.dtype)
    return scale * (cosine - one_hot * m)


def _run_case(key, N, D, C, scale_s=30.0, margin_m=0.4):
    kx, kw, kl = jax.random.split(key, 3)
    x = jax.random.normal(kx, (N, D), dtype=jnp.float32)
    # Xavier-uniform-style weight init, as in the PyTorch module.
    limit = (6.0 / (D + C)) ** 0.5
    weight = jax.random.uniform(kw, (C, D), minval=-limit, maxval=limit,
                                dtype=jnp.float32)
    label = jax.random.randint(kl, (N,), 0, C, dtype=jnp.int32)

    out = margin_cosine_product(x, weight, label, scale=scale_s, m=margin_m)
    out = jax.block_until_ready(out)
    ref = reference_mcp(x, weight, label, scale=scale_s, m=margin_m)

    assert out.shape == (N, C)
    # bf16 MXU operands + approx reciprocal -> bf16-level tolerance vs f32 ref.
    assert jnp.allclose(out, ref, atol=5e-2, rtol=1e-2), (
        f"mismatch vs reference (max abs diff {jnp.max(jnp.abs(out - ref))})")


if __name__ == "__main__":
    key = jax.random.PRNGKey(0)
    k1, k2 = jax.random.split(key)

    # Aligned shapes: batch=8, in_features=128, out_features=256.
    _run_case(k1, N=8, D=128, C=256)
    # Awkward shapes to exercise pad-and-slice: batch=6, in=96, out=200.
    _run_case(k2, N=6, D=96, C=200)

    print("KERNEL_OK")
</pallas_src>

<mosaic_0001>
module attributes {stable_mosaic.version = 11 : i64} {
  func.func @mcp_kernel(%arg0: i32, %arg1: i32, %arg2: memref<8x128xbf16, #tpu.memory_space<vmem>>, %arg3: memref<128x128xbf16, #tpu.memory_space<vmem>>, %arg4: memref<8x1xf32, #tpu.memory_space<vmem>>, %arg5: memref<1x128xf32, #tpu.memory_space<vmem>>, %arg6: memref<8x1xi32, #tpu.memory_space<vmem>>, %arg7: memref<8x128xf32, #tpu.memory_space<vmem>>) attributes {dimension_semantics = [#tpu.dimension_semantics<parallel>, #tpu.dimension_semantics<parallel>], iteration_bounds = array<i64: 1, 2>, scalar_prefetch = 0 : i64, scratch_operands = 0 : i64, tpu.core_type = #tpu.core_type<tc>, window_params = [{transform_indices = @transform_0, window_bounds = array<i64: 8, 128>}, {transform_indices = @transform_1, window_bounds = array<i64: 128, 128>}, {transform_indices = @transform_2, window_bounds = array<i64: 8, 1>}, {transform_indices = @transform_3, window_bounds = array<i64: 1, 128>}, {transform_indices = @transform_4, window_bounds = array<i64: 8, 1>}, {transform_indices = @transform_5, window_bounds = array<i64: 8, 128>}]} {
    %c0 = arith.constant 0 : index
    %c0_0 = arith.constant 0 : index
    %0 = vector.load %arg2[%c0, %c0_0] : memref<8x128xbf16, #tpu.memory_space<vmem>>, vector<8x128xbf16>
    %c0_1 = arith.constant 0 : index
    %c0_2 = arith.constant 0 : index
    %1 = vector.load %arg3[%c0_1, %c0_2] : memref<128x128xbf16, #tpu.memory_space<vmem>>, vector<128x128xbf16>
    %cst = arith.constant dense<0.000000e+00> : vector<8x128xf32>
    %2 = tpu.matmul %0, %1, %cst {dimension_numbers = #tpu.dot_dimension_numbers<[1], [1], [0], [0], [0, 0, 1, 0], [], []>} : vector<8x128xbf16>, vector<128x128xbf16>, vector<8x128xf32> -> vector<8x128xf32>
    %c0_3 = arith.constant 0 : index
    %c0_4 = arith.constant 0 : index
    %3 = vector.load %arg4[%c0_3, %c0_4] : memref<8x1xf32, #tpu.memory_space<vmem>>, vector<8x1xf32>
    %c0_5 = arith.constant 0 : index
    %c0_6 = arith.constant 0 : index
    %4 = vector.load %arg5[%c0_5, %c0_6] : memref<1x128xf32, #tpu.memory_space<vmem>>, vector<1x128xf32>
    %5 = vector.broadcast %3 : vector<8x1xf32> to vector<8x128xf32>
    %6 = vector.broadcast %4 : vector<1x128xf32> to vector<8x128xf32>
    %7 = arith.mulf %5, %6 : vector<8x128xf32>
    %cst_7 = arith.constant 3.33333333E-10 : f32
    %8 = vector.broadcast %cst_7 : f32 to vector<8x128xf32>
    %9 = arith.maximumf %7, %8 : vector<8x128xf32>
    %10 = tpu.reciprocal %9 {approx = true} : vector<8x128xf32> -> vector<8x128xf32>
    %11 = arith.mulf %2, %10 : vector<8x128xf32>
    %c0_8 = arith.constant 0 : index
    %c0_9 = arith.constant 0 : index
    %12 = vector.load %arg6[%c0_8, %c0_9] : memref<8x1xi32, #tpu.memory_space<vmem>>, vector<8x1xi32>
    %c128_i32 = arith.constant 128 : i32
    %13 = arith.muli %arg1, %c128_i32 : i32
    %14 = vector.broadcast %13 : i32 to vector<8x1xi32>
    %15 = arith.subi %12, %14 : vector<8x1xi32>
    %16 = tpu.iota {dimensions = array<i32: 1>} : vector<8x128xi32>
    %17 = vector.broadcast %15 : vector<8x1xi32> to vector<8x128xi32>
    %18 = arith.cmpi eq, %16, %17 : vector<8x128xi32>
    %cst_10 = arith.constant 1.200000e+01 : f32
    %19 = vector.broadcast %cst_10 : f32 to vector<8x128xf32>
    %20 = arith.subf %11, %19 : vector<8x128xf32>
    %21 = arith.select %18, %20, %11 : vector<8x128xi1>, vector<8x128xf32>
    %c0_11 = arith.constant 0 : index
    %c0_12 = arith.constant 0 : index
    %22 = vector.load %arg7[%c0_11, %c0_12] : memref<8x128xf32, #tpu.memory_space<vmem>>, vector<8x128xf32>
    tpu.vector_store %arg7[%c0_11, %c0_12], %21 {strides = array<i32>} : memref<8x128xf32, #tpu.memory_space<vmem>>, vector<8x128xf32>,
    return
  }
  func.func @transform_0(%arg0: i32, %arg1: i32) -> (i32, i32) {
    %c0_i32 = arith.constant 0 : i32
    %c0_i32_0 = arith.constant 0 : i32
    return %arg0, %c0_i32 : i32, i32
  }
  func.func @transform_1(%arg0: i32, %arg1: i32) -> (i32, i32) {
    %c0_i32 = arith.constant 0 : i32
    %c0_i32_0 = arith.constant 0 : i32
    return %arg1, %c0_i32 : i32, i32
  }
  func.func @transform_2(%arg0: i32, %arg1: i32) -> (i32, i32) {
    %c0_i32 = arith.constant 0 : i32
    %c0_i32_0 = arith.constant 0 : i32
    return %arg0, %c0_i32 : i32, i32
  }
  func.func @transform_3(%arg0: i32, %arg1: i32) -> (i32, i32) {
    %c0_i32 = arith.constant 0 : i32
    %c0_i32_0 = arith.constant 0 : i32
    return %c0_i32, %arg1 : i32, i32
  }
  func.func @transform_4(%arg0: i32, %arg1: i32) -> (i32, i32) {
    %c0_i32 = arith.constant 0 : i32
    %c0_i32_0 = arith.constant 0 : i32
    return %arg0, %c0_i32 : i32, i32
  }
  func.func @transform_5(%arg0: i32, %arg1: i32) -> (i32, i32) {
    %c0_i32 = arith.constant 0 : i32
    return %arg0, %arg1 : i32, i32
  }
}

</mosaic_0001>

<bundles_post_ra>
// kernel: tpu_custom_call.1
= control target key start
LH: loop header
LB: loop body
LE: loop exit
PB: predicated region body
PF: predicated region fallthrough
CT: control target
= control target key end

     0   :  { %10 = vsyncpa [#allocation3], 0  ;;  %s1098_s0 = inlined_call_operand.vmem [shape: bf16[8,128], index: 0, kind: input, shape index: {}]   ;;  %s1099_s1 = inlined_call_operand.hbm [shape: bf16[256,128], index: 1, kind: input, shape index: {}]   ;;  %s1100_s2 = inlined_call_operand.vmem [shape: f32[8,1], index: 2, kind: input, shape index: {}]   ;;  %s1101_s3 = inlined_call_operand.vmem [shape: f32[1,256], index: 3, kind: input, shape index: {}]   ;;  %s1102_s4 = inlined_call_operand.vmem [shape: s32[8,1], index: 4, kind: input, shape index: {}]   ;;  %s1103_s5 = inlined_call_operand.hbm [shape: f32[8,256], index: 5, kind: output, shape index: {}]  }
   0x1   :  { %12 = vsyncpa [#allocation3 + $0x1], 0 }
   0x2   :  { %13 = vsyncpa [#allocation4], 0 }
   0x3   :  { %15 = vsyncpa [#allocation4 + $0x1], 0  ;;  %s896_s18 = smov 0   ;;  %s898_s19 = smov 0  }
   0x4   :  { %s900_s20 = smov 0   ;;  %s902_s21 = smov 0  }
   0x5   :  { %s904_s22 = smov 0   ;;  %s906_s23 = smov 0  }
   0x6 LB: > { %s609_s24 = sadd.s32 4294967295, %s857_s23   ;;  %s610_s25 = sadd.s32 4294967294, %s857_s23   ;;  %s857_s23 = sphi %s906_s23, %s21_s23   ;;  %s853_s22 = sphi %s904_s22, %s1118_s22   ;;  %s849_s21 = sphi %s902_s21, %s1117_s21   ;;  %s845_s20 = sphi %s900_s20, %s1116_s20   ;;  %s841_s19 = sphi %s898_s19, %s1115_s19   ;;  %s837_s18 = sphi %s896_s18, %s1114_s18  }
   0x7   : > { %s30_s26 = sadd.s32 1, %s853_s22  ;;  %s66_s27 = sadd.s32 1, %s845_s20 }
   0x8   : > { %p31_p0 = scmp.ge.s32.totalorder %s30_s26, 2  ;;  %p73_p1 = scmp.ne.s32.totalorder %s845_s20, %s841_s19 }
   0x9   : > { %p74_p2 = scmp.eq.s32.totalorder %s857_s23, 0  ;;  %p79_p3 = scmp.ne.s32.totalorder %s841_s19, %s837_s18 }
   0xa   : > { %s1120_s26 = smov (%p31_p0, %s30_s26), 0  ;;  %p80_p5 = scmp.eq.s32.totalorder %s609_s24, 0 }
   0xb   : > { %p937_p4 = por %p74_p2, %p73_p1  ;;  %s63_s29 = ssub.s32 %s853_s22, %s1120_s26 }
   0xc   : > { %p183_p6 = scmp.eq.s32.totalorder %s609_s24, 1  ;;  %p64_p7 = scmp.eq.s32.totalorder %s63_s29, 0 }
   0xd   : > { %p943_p8 = por %p80_p5, %p79_p3  ;;  %p189_p10 = scmp.eq.s32.totalorder %s610_s25, 1 }
   0xe   : > { %p947_p9 = por %p183_p6, %p73_p1  ;;  %p679_p13 = scmp.lt.s32.totalorder %s857_s23, 2 }
   0xf   : > { %s952_s7 = scalar_select %p64_p7, %s845_s20, %s66_s27  }
  0x10   : > { %s1107_s6 = scalar_select %p947_p9, 1, 0 }
  0x11   : > { %p954_p11 = por %p189_p10, %p79_p3  ;;  %s230_s9 = sand.u32 1, %s845_s20  }
  0x12   : > { %s616_s10 = sshll.u32 %s230_s9, 6  ;;  %s637_s11 = sshll.u32 %s853_s22, 10 }
  0x13   : > { %s1108_s8 = scalar_select %p954_p11, 1, 0 }
  0x14   : > { %s965_s14 = scalar_lea.hbm %s1099_s1, %s637_s11  ;;  %s234_s15 = scalar_lea.vmem [#allocation2], %s616_s10 }
  0x15   : > { %s241_s16 = sshll.u32 %s234_s15, 4  ;;  %p971_p0 = pnand %p679_p13, %p937_p4  ;;  %s967_s16 = int_to_ptr.vmem [resolvable:$true] %s241_s16 }
  0x16   : > { %s976_s24 = scalar_lea.sflag [#allocation3], %s230_s9  ;;  %s745_s25 = scalar_lea.hbm %s965_s14, 1024 }
  0x17   : > { %p746_p2 = scmp.ne.s32.totalorder %s965_s14, %s745_s25  ;;  %p747_p3 = pneg %p971_p0 }
  0x18   : > { %s750_s28 = scalar_lea.hbm %s1099_s1, 2048  ;;  %p751_p4 = scmp.lt.u32.totalorder %s965_s14, %s1099_s1 }
  0x19   : > { %p748_p5 = pnand %p747_p3, %p746_p2  ;;  %p752_p7 = scmp.lt.u32.totalorder %s750_s28, %s745_s25 }
  0x1a   : > { %p754_p13 = scmp.lt.u32.totalorder %s745_s25, %s965_s14 }
  0x1b   : > { %p749_p6 = pneg %p748_p5  ;;  %p753_p10 = por %p752_p7, %p751_p4 }
  0x1d   : > { %p755_p12 = por %p754_p13, %p753_p10 }
  0x1f   : > { %p756_p1 = pnand %p755_p12, %p749_p6 }
  0x21   : > { %759 = shalt.err (!%p756_p1)
}
  0x22   : > { %s760_s9 = scalar_lea.vmem %s967_s16, 1024  ;;  %s859_s12 = smov [#allocation2]  }
  0x23   : > { %p761_p2 = scmp.ne.s32.totalorder %s967_s16, %s760_s9  ;;  %s765_s13 = sshll.u32 %s859_s12, 4  ;;  %s766_s13 = int_to_ptr.vmem [resolvable:$false] %s765_s13 }
  0x24   : > { %s767_s15 = scalar_lea.vmem %s766_s13, 2048  ;;  %p768_p9 = scmp.lt.s32.totalorder %s967_s16, %s766_s13 }
  0x25   : > { %p763_p5 = pnand %p761_p2, %p747_p3  ;;  %p769_p4 = scmp.lt.s32.totalorder %s767_s15, %s760_s9 }
  0x27   : > { %p764_p11 = pneg %p763_p5  ;;  %p770_p7 = por %p769_p4, %p768_p9 }
  0x29   : > { %p771_p10 = pnand %p770_p7, %p764_p11 }
  0x2b   : > { %774 = shalt.err (!%p771_p10)
}
  0x2c   : > { %s860_s25 = smov 64   ;;  %s861_s27 = smov 4  }
  0x2d   : > { %674 = dma.hbm_to_vmem [thread:$0]  (!%p971_p0), %s965_s14, 1024, %s967_s16, %s976_s24, %s860_s25, %s860_s25, %s861_s27  }
  0x2e   : > { %p255_p12 = scmp.lt.s32.totalorder %s857_s23, 3  ;;  %p1110_p1 = scmp.ge.s32.totalorder %s857_s23, 1 }
  0x30   : > { %p256_p3 = pnand %p1110_p1, %p255_p12 }
  0x31   : > { %s1008_s29 = sand.u32 (!%p256_p3), 1, %s841_s19  }
  0x32   : > { %259 = sbr.rel (%p256_p3) target bundleno = 354 (0x162), region = 40  ;;  %s620_s28 = sshll.u32 (!%p256_p3), %s1008_s29, 6 }
  0x33   : > { %s262_s10 = scalar_lea.sflag (!%p256_p3), [#allocation3], %s1008_s29  ;;  %s1012_s11 = scalar_lea.vmem (!%p256_p3), [#allocation2], %s620_s28 }
  0x39   : > { %828 = dma.done.wait (%p943_p8), %s262_s10, 1024  }
  0x3a   : > { %830 = vsyncadd (%p943_p8), %s262_s10, 4294966272  ;;  %v862_v0 = vmov 0.0   ;;  %vm863_vm0 = vmmov 0   ;;  %v864_v1 = vmov 0   ;;  %v735_v2 = vld [vmem:[%s1012_s11] sm:$0xff]   ;;  %s631_s14 = sshll.u32 %s849_s21, 7  ;;  %v450_v19 = vlaneseq }
  0x3b   : > { %647 = vmatprep.subr.bf16.mxu0 %v862_v0  ;;  %663 = vmatprep.mubr.msk.bf16.mxu0 %vm863_vm0, %v862_v0  ;;  %v736_v3 = vld [vmem:[%s1012_s11 + $0x8] sm:$0xff]   ;;  %v448_v4 = vstv %s631_s14  ;;  %v429_v5 = vld [vmem:[%s1100_s2] sm:$0xff]  ;;  %v737_v8 = vld [vmem:[%s1012_s11 + $0x10] sm:$0xff]   ;;  %p316_p8 = scmp.lt.s32.totalorder %s849_s21, 1  ;;  %s621_s28 = sshll.u32 %s1008_s29, 3 }
  0x3c   : > { %734 = vset.pattern.permute.xlu0 %v864_v1  ;;  %648 = vmatpush3.bf16.xpose.msra.mxu0 %v735_v2  ;;  %v446_v6 = vld [vmem:[%s1102_s4] sm:$0xff]  ;;  %v738_v9 = vld [vmem:[%s1012_s11 + $0x18] sm:$0xff]   ;;  %v740_v11 = vld [vmem:[%s1012_s11 + $0x28] sm:$0xff]   ;;  %v451_v21 = vand.u32 127, %v450_v19  ;;  %s306_s10 = scalar_lea.vmem [#allocation5], %s621_s28  ;;  %s1049_s17 = scalar_lea.hbm %s1103_s5, %s631_s14 }
  0x3d   : > { %649 = vmatprep.subr.bf16.mxu0 %v862_v0  ;;  %433 = vperm.xlu0 %734, %v429_v5   ;;  %v449_v7 = vsub.s32 %v446_v6, %v448_v4  ;;  %v739_v10 = vld [vmem:[%s1012_s11 + $0x20] sm:$0xff]   ;;  %v741_v12 = vld [vmem:[%s1012_s11 + $0x30] sm:$0xff]   ;;  %v742_v13 = vld [vmem:[%s1012_s11 + $0x38] sm:$0xff]   ;;  %s317_s13 = scalar_select %p316_p8, %s849_s21, 1 }
  0x3e   : > { %v324_v14 = vld [vmem:[%s1098_s0] sm:$0xf]  ;;  %s475_s11 = sshll.u32 %s306_s10, 4  ;;  %s460_s24 = scalar_lea.sflag [#allocation4], %s1008_s29  ;;  %s1051_s11 = int_to_ptr.vmem [resolvable:$true] %s475_s11 }
  0x3f   : > { %s318_s27 = scalar_lea.vmem %s1101_s3, %s317_s13  ;;  %s775_s9 = scalar_lea.vmem %s1051_s11, 128 }
  0x40   : > { %v630_v15 = vld [vmem:[%s318_s27] ss:$0 sm:$0xff]  ;;  %p776_p9 = scmp.ne.s32.totalorder %s1051_s11, %s775_s9  ;;  %p1111_p11 = scmp.ne.s32.totalorder %s1107_s6, 0 }
  0x41   : > { %453 = vperm.xlu0 %734, %v449_v7   ;;  %s865_s12 = smov [#allocation5]  }
  0x42   : > { %p777_p0 = pnand %p776_p9, %p1111_p11  ;;  %s779_s21 = sshll.u32 %s865_s12, 4  ;;  %s780_s21 = int_to_ptr.vmem [resolvable:$false] %s779_s21 }
  0x43   : > { %s781_s13 = scalar_lea.vmem %s780_s21, 256  ;;  %p782_p13 = scmp.lt.s32.totalorder %s1051_s11, %s780_s21 }
  0x44   : > { %650 = vmatpush3.bf16.xpose.msra.mxu0 %v736_v3  ;;  %p778_p6 = pneg %p777_p0  ;;  %p783_p2 = scmp.lt.s32.totalorder %s781_s13, %s775_s9 }
  0x45   : > { %651 = vmatprep.subr.bf16.mxu0 %v862_v0 }
  0x46   : > { %p784_p5 = por %p783_p2, %p782_p13 }
  0x48   : > { %p785_p4 = pnand %p784_p5, %p778_p6 }
  0x4c   : > { %652 = vmatpush3.bf16.xpose.msra.mxu0 %v737_v8 }
  0x4d   : > { %653 = vmatprep.subr.bf16.mxu0 %v862_v0 }
  0x54   : > { %654 = vmatpush3.bf16.xpose.msra.mxu0 %v738_v9 }
  0x55   : > { %655 = vmatprep.subr.bf16.mxu0 %v862_v0 }
  0x5c   : > { %656 = vmatpush3.bf16.xpose.msra.mxu0 %v739_v10 }
  0x5d   : > { %657 = vmatprep.subr.bf16.mxu0 %v862_v0 }
  0x64   : > { %658 = vmatpush3.bf16.xpose.msra.mxu0 %v740_v11 }
  0x65   : > { %659 = vmatprep.subr.bf16.mxu0 %v862_v0 }
  0x6c   : > { %660 = vmatpush3.bf16.xpose.msra.mxu0 %v741_v12 }
  0x6d   : > { %661 = vmatprep.subr.bf16.mxu0 %v862_v0 }
  0x74   : > { %662 = vmatpush3.bf16.xpose.msra.mxu0 %v742_v13 }
  0x7b   : > { %664 = vmatmul.mubr.bf16.vlgmr.msra.gmra.mrb[0].mxu0 %v324_v14 }
  0xbc   : > { %v434_v16 = vpop.permute.xlu0 %433 }
  0xbd   : > { %v442_v17 = vmul.f32 %v630_v15, %v434_v16 }
  0xbf   : > { %v443_v18 = vmax.f32 %v442_v17, 3.3333333e-10 }
  0xc0   : > { %v454_v23 = vpop.permute.xlu0 %453 }
  0xc1   : > { %743 = vrcp.f32 %v443_v18  ;;  %vm455_vm1 = vcmp.eq.s32.totalorder %v451_v21, %v454_v23 }
  0xcb   : > { %v744_v20 = vpop.eup %743 }
 0x14e   : > { %v423_v22 = vpop.f32.mrb[0].mxu0 }
 0x14f   : > { %v445_v24 = vmul.f32 %v744_v20, %v423_v22  ;;  %v665_v25 = vpop.f32.mrb[1].mxu0 }
 0x150   : > { %v426_v26 = vpop.f32.mrb[2].mxu0 }
 0x151   : > { %v632_v27 = vadd.f32 -12.0, %v445_v24  ;;  %v666_v28 = vpop.f32.mrb[3].mxu0 }
 0x153   : > { %v457_v29 = vsel %vm455_vm1, %v632_v27, %v445_v24 }
 0x154   : > { %458 = vst [vmem:[%s306_s10] sm:$0xff] %v457_v29 }
 0x155   : > { %788 = shalt.err (!%p785_p4)
}
 0x156   : > { %s789_s29 = scalar_lea.hbm %s1049_s17, 128  ;;  %s793_s25 = scalar_lea.hbm %s1103_s5, 256 }
 0x157   : > { %p790_p7 = scmp.ne.s32.totalorder %s1049_s17, %s789_s29  ;;  %p794_p1 = scmp.lt.u32.totalorder %s1049_s17, %s1103_s5 }
 0x158   : > { %p795_p3 = scmp.lt.u32.totalorder %s793_s25, %s789_s29  ;;  %p797_p9 = scmp.lt.u32.totalorder %s789_s29, %s1049_s17 }
 0x159   : > { %p791_p10 = pnand %p790_p7, %p1111_p11 }
 0x15a   : > { %p796_p8 = por %p795_p3, %p794_p1 }
 0x15b   : > { %p792_p12 = pneg %p791_p10 }
 0x15c   : > { %p798_p0 = por %p797_p9, %p796_p8 }
 0x15e   : > { %p799_p6 = pnand %p798_p0, %p792_p12 }
 0x160   : > { %802 = shalt.err (!%p799_p6)
}
 0x161   : > { %669 = dma.vmem_to_hbm [thread:$0]  (%p1111_p11), %s1051_s11, 128, %s1049_s17, %s460_s24  }
 0x162 PF: > { %s487_s10 = sand.u32 1, %s837_s18   ;;  %p1112_p13 = scmp.ne.s32.totalorder %s1108_s8, 0 }
 0x163   : > { %p1113_p2 = scmp.ge.s32.totalorder %s857_s23, 2  ;;  %s488_s30 = scalar_lea.sflag [#allocation4], %s487_s10 }
 0x165   : > { %p676_p5 = pnand %p1113_p2, %p1112_p13 }
 0x167   : > { %832 = dma.done.wait (!%p676_p5), %s488_s30, 128  }
 0x168   : > { %834 = vsyncadd (!%p676_p5), %s488_s30, 4294967168  ;;  %s21_s23 = sadd.s32 1, %s857_s23   ;;  %s1114_s18 = smov %s841_s19 }
 0x169   : > { %p18_p4 = scmp.ge.s32.totalorder %s21_s23, 4   ;;  %s1115_s19 = smov %s845_s20 }
 0x16a   : > { %s1116_s20 = smov %s952_s7  ;;  %s1117_s21 = smov %s853_s22 }
 0x16b   : > { %s1118_s22 = smov %s1120_s26  ;;  %20 = sbr.rel (!%p18_p4) target bundleno = 6 (0x6), region = 97 }
 0x172   :  { %493 = vsyncpa [#allocation3], 1 }
 0x173   :  { %495 = vsyncpa [#allocation3 + $0x1], 1 }
 0x174   :  { %496 = vsyncpa [#allocation4], 1 }
 0x175   :  { %498 = vsyncpa [#allocation4 + $0x1], 1 }

</bundles_post_ra>
